<compile_context>
chip_gen: v7x
topology: tpu7x:2x2x1
jax: 0.10.0
libtpu: 0.0.40
codegen_flags: <defaults>
</compile_context>

<pallas_src>
import jax
import jax.numpy as jnp
from jax.experimental import pallas as pl
from jax.experimental.pallas import tpu as pltpu


def edge_conv_kernel(blk_ref, first_ref, last_ref, has_ref,    # scalar prefetch (SMEM)
                     dst_ref, feat_ref, w_ref,                 # VMEM inputs
                     out_ref,                                  # output node block
                     acc_ref):                                 # f32 VMEM accumulator
    del blk_ref  # consumed only by the index_maps
    t = pl.program_id(0)

    # Reset the accumulator at the first edge tile of each node block (runs
    # even for zero-edge blocks so they emit exact zeros).
    @pl.when(first_ref[t] == 1)
    def _():
        acc_ref[...] = jnp.zeros_like(acc_ref)

    # Skip all MXU/VPU work on all-padding tiles (per-block padding and the
    # trailing capacity slack); the accumulator carries through unchanged.
    @pl.when(has_ref[t] == 1)
    def _():
        # Message Linear: single bf16 GEMM, K = dim_in + edge_dim, f32 acc.
        msg = jnp.dot(feat_ref[...], w_ref[...],
                      preferred_element_type=jnp.float32)      # (tile_e, dim_out)

        tile_n = acc_ref.shape[0]
        tile_e = feat_ref.shape[0]

        # Scatter-add inside the current node block via a (tile_n, tile_e)
        # one-hot bf16 matmul (K = tile_e on the MXU).  Padded edges have zero
        # features, so whatever row they select receives exact zero.
        dst_row = dst_ref[...]                                 # (1, tile_e)
        node_iota = jax.lax.broadcasted_iota(jnp.int32, (tile_n, tile_e), 0)
        onehot = (node_iota == dst_row).astype(jnp.bfloat16)   # exact 0/1 in bf16
        acc_ref[...] += jnp.dot(onehot, msg.astype(jnp.bfloat16),
                                preferred_element_type=jnp.float32)

    # Flush the finished node block to its (revisited) output window.
    @pl.when(last_ref[t] == 1)
    def _():
        out_ref[...] = acc_ref[...]


def _edge_schedule(dst, num_nodes, tile_e, tile_n):
    """Destination-sorted edge schedule + per-tile metadata.

    Depends only on (edge_index, N, tile sizes): for static graphs (GraphGym
    reuses the same graph across layers / epochs) the whole result can be
    computed once and cached; only the feature scatter in general_edge_conv
    depends on the per-layer activations.
    """
    E = dst.shape[0]
    num_blocks = -(-num_nodes // tile_n)

    order = jnp.argsort(dst)
    dst_s = dst[order]

    blk_of_edge = dst_s // tile_n                                       # (E,)
    counts = jnp.bincount(blk_of_edge, length=num_blocks)               # edges / block
    padded_counts = jnp.maximum(
        ((counts + tile_e - 1) // tile_e) * tile_e, tile_e)             # >= 1 tile each
    off = jnp.concatenate(
        [jnp.zeros((1,), padded_counts.dtype), jnp.cumsum(padded_counts)])
    edge_start = jnp.concatenate(
        [jnp.zeros((1,), counts.dtype), jnp.cumsum(counts)])

    # Static capacity bound (each block adds at most tile_e padding slots).
    capacity = ((E + tile_e - 1) // tile_e) * tile_e + num_blocks * tile_e
    num_tiles = capacity // tile_e

    # Slot of every real (sorted) edge inside the padded edge stream.
    pos = off[blk_of_edge] + (jnp.arange(E, dtype=jnp.int32)
                              - edge_start[blk_of_edge])

    # Destination row within its node block, (1, capacity) lane-dense (no 8x
    # sublane broadcast; padding slots keep rel id 0 and zero features).
    rel_dst = jnp.zeros((capacity,), jnp.int32).at[pos].set(
        dst_s - blk_of_edge * tile_n)[None, :]

    # Per-tile metadata (scalar-prefetched to SMEM): owning node block,
    # first/last-tile-of-block flags, and whether the tile holds any real edge.
    tile_start = jnp.arange(num_tiles, dtype=jnp.int32) * tile_e
    blk_ids = jnp.clip(jnp.searchsorted(off[1:], tile_start, side="right"),
                       0, num_blocks - 1).astype(jnp.int32)
    change = blk_ids[1:] != blk_ids[:-1]
    is_first = jnp.concatenate([jnp.array([True]), change]).astype(jnp.int32)
    is_last = jnp.concatenate([change, jnp.array([True])]).astype(jnp.int32)
    block_end = off[:-1] + counts                                        # real-edge end
    has_edges = (tile_start < block_end[blk_ids]).astype(jnp.int32)

    return (order, pos, capacity, num_tiles, num_blocks,
            blk_ids, is_first, is_last, has_edges, rel_dst)


def general_edge_conv(x, edge_index, edge_feature, w, *, tile_e=1024, tile_n=128):
    """x: (N, dim_in) f32, edge_index: (2, E) int32 [src; dst],
    edge_feature: (E, edge_dim) f32, w: (dim_in+edge_dim, dim_out) f32
    (transposed nn.Linear weight, bias=False).  Returns (N, dim_out) f32.

    All matmuls run with bf16 inputs / f32 accumulation on the MXU.
    """
    N, dim_in = x.shape
    E = edge_index.shape[1]
    edge_dim = edge_feature.shape[1]
    d_msg, dim_out = w.shape
    assert d_msg == dim_in + edge_dim
    assert tile_e % 128 == 0 and tile_n % 8 == 0

    src = edge_index[0]
    dst = edge_index[1].astype(jnp.int32)

    # ---- wrapper glue (cacheable for static graphs) ----
    (order, pos, capacity, num_tiles, num_blocks,
     blk_ids, is_first, is_last, has_edges, rel_dst) = _edge_schedule(
         dst, N, tile_e, tile_n)
    n_pad = num_blocks * tile_n

    # Gather source features, fuse with edge features, and scatter into the
    # padded destination-sorted edge stream (padding stays all-zero).  One
    # (capacity, d_msg) bf16 buffer -> single K = d_msg GEMM in the kernel.
    feat_s = jnp.concatenate([x[src[order]], edge_feature[order]],
                             axis=1).astype(jnp.bfloat16)
    feat_p = jnp.zeros((capacity, d_msg), jnp.bfloat16).at[pos].set(feat_s)
    w_bf16 = w.astype(jnp.bfloat16)

    out_pad = pl.pallas_call(
        edge_conv_kernel,
        out_shape=jax.ShapeDtypeStruct((n_pad, dim_out), jnp.float32),
        grid_spec=pltpu.PrefetchScalarGridSpec(
            num_scalar_prefetch=4,
            grid=(num_tiles,),
            in_specs=[
                pl.BlockSpec((1, tile_e),
                             lambda t, blk, fst, lst, hse: (0, t)),        # rel dst
                pl.BlockSpec((tile_e, d_msg),
                             lambda t, blk, fst, lst, hse: (t, 0)),        # [x_j || e_f]
                pl.BlockSpec((d_msg, dim_out),
                             lambda t, blk, fst, lst, hse: (0, 0)),        # W
            ],
            out_specs=pl.BlockSpec((tile_n, dim_out),
                                   lambda t, blk, fst, lst, hse: (blk[t], 0)),
            scratch_shapes=[pltpu.VMEM((tile_n, dim_out), jnp.float32)],
        ),
        compiler_params=pltpu.CompilerParams(
            dimension_semantics=("arbitrary",),
            # Stays well under v7x's 64 MiB physical VMEM; ample on v5e/v6e.
            vmem_limit_bytes=48 * 1024 * 1024,
        ),
    )(blk_ids, is_first, is_last, has_edges, rel_dst, feat_p, w_bf16)

    return out_pad[:N]


if __name__ == "__main__":
    key = jax.random.PRNGKey(0)
    k_x, k_ef, k_ei, k_w = jax.random.split(key, 4)

    # Small graph: N=64 nodes, E=512 edges, dim_in=32, edge_dim=16, dim_out=128
    N, E, dim_in, edge_dim, dim_out = 64, 512, 32, 16, 128
    d_msg = dim_in + edge_dim

    x = jax.random.normal(k_x, (N, dim_in), dtype=jnp.float32)
    edge_feature = jax.random.normal(k_ef, (E, edge_dim), dtype=jnp.float32)
    edge_index = jax.random.randint(k_ei, (2, E), 0, N, dtype=jnp.int32)

    # Deterministic nn.Linear-style init (uniform +-1/sqrt(fan_in)), bias=False.
    bound = 1.0 / (d_msg ** 0.5)
    w = jax.random.uniform(k_w, (d_msg, dim_out), jnp.float32, -bound, bound)

    out = general_edge_conv(x, edge_index, edge_feature, w, tile_e=256, tile_n=32)
    out = jax.block_until_ready(out)

    # Pure-JAX f32 reference: gather -> linear -> scatter-add over dst.
    msg_ref = x[edge_index[0]] @ w[:dim_in] + edge_feature @ w[dim_in:]
    ref = jnp.zeros((N, dim_out), jnp.float32).at[edge_index[1]].add(msg_ref)

    assert out.shape == (N, dim_out)
    # bf16 MXU inputs + bf16 message rounding before the scatter: per-node
    # error grows ~sqrt(degree) (avg degree ~8 here), so tolerance is the
    # bf16-appropriate 1e-1; a dropped or misrouted edge (message magnitude
    # ~0.5) would still trip this check.
    assert jnp.allclose(out, ref, atol=1e-1, rtol=1e-1), "mismatch vs reference"
    print("KERNEL_OK")
</pallas_src>

<mosaic_0001>
module attributes {stable_mosaic.version = 11 : i64} {
  func.func @edge_conv_kernel(%arg0: i32, %arg1: memref<4xi32, #tpu.memory_space<smem>>, %arg2: memref<4xi32, #tpu.memory_space<smem>>, %arg3: memref<4xi32, #tpu.memory_space<smem>>, %arg4: memref<4xi32, #tpu.memory_space<smem>>, %arg5: memref<1x256xi32, #tpu.memory_space<vmem>>, %arg6: memref<256x48xbf16, #tpu.memory_space<vmem>>, %arg7: memref<48x128xbf16, #tpu.memory_space<vmem>>, %arg8: memref<32x128xf32, #tpu.memory_space<vmem>>, %arg9: memref<32x128xf32, #tpu.memory_space<vmem>>) attributes {dimension_semantics = [#tpu.dimension_semantics<arbitrary>], iteration_bounds = array<i64: 4>, scalar_prefetch = 4 : i64, scratch_operands = 1 : i64, tpu.core_type = #tpu.core_type<tc>, window_params = [{transform_indices = @transform_0, window_bounds = array<i64: 1, 256>}, {transform_indices = @transform_1, window_bounds = array<i64: 256, 48>}, {pipeline_mode = #tpu.pipeline_mode<synchronous>, transform_indices = @transform_2, window_bounds = array<i64: 48, 128>}, {transform_indices = @transform_3, window_bounds = array<i64: 32, 128>}]} {
    %0 = arith.index_cast %arg0 : i32 to index
    %1 = memref.load %arg2[%0] : memref<4xi32, #tpu.memory_space<smem>>
    %c1_i32 = arith.constant 1 : i32
    %2 = arith.cmpi eq, %1, %c1_i32 : i32
    %3 = arith.extui %2 : i1 to i32
    %c0_i32 = arith.constant 0 : i32
    %4 = arith.cmpi ne, %3, %c0_i32 : i32
    scf.if %4 {
      %cst = arith.constant 0.000000e+00 : f32
      %15 = vector.broadcast %cst : f32 to vector<32x128xf32>
      %c0 = arith.constant 0 : index
      %c0_4 = arith.constant 0 : index
      %16 = vector.load %arg9[%c0, %c0_4] : memref<32x128xf32, #tpu.memory_space<vmem>>, vector<32x128xf32>
      tpu.vector_store %arg9[%c0, %c0_4], %15 {strides = array<i32>} : memref<32x128xf32, #tpu.memory_space<vmem>>, vector<32x128xf32>,
    } else {
    }
    %5 = arith.index_cast %arg0 : i32 to index
    %6 = memref.load %arg4[%5] : memref<4xi32, #tpu.memory_space<smem>>
    %c1_i32_0 = arith.constant 1 : i32
    %7 = arith.cmpi eq, %6, %c1_i32_0 : i32
    %8 = arith.extui %7 : i1 to i32
    %c0_i32_1 = arith.constant 0 : i32
    %9 = arith.cmpi ne, %8, %c0_i32_1 : i32
    scf.if %9 {
      %c0 = arith.constant 0 : index
      %c0_4 = arith.constant 0 : index
      %15 = vector.load %arg6[%c0, %c0_4] : memref<256x48xbf16, #tpu.memory_space<vmem>>, vector<256x48xbf16>
      %c0_5 = arith.constant 0 : index
      %c0_6 = arith.constant 0 : index
      %16 = vector.load %arg7[%c0_5, %c0_6] : memref<48x128xbf16, #tpu.memory_space<vmem>>, vector<48x128xbf16>
      %cst = arith.constant dense<0.000000e+00> : vector<256x128xf32>
      %17 = tpu.matmul %15, %16, %cst {dimension_numbers = #tpu.dot_dimension_numbers<[1], [0], [0], [1], [0, 0, 1, 1], [], []>} : vector<256x48xbf16>, vector<48x128xbf16>, vector<256x128xf32> -> vector<256x128xf32>
      %c0_7 = arith.constant 0 : index
      %c0_8 = arith.constant 0 : index
      %18 = vector.load %arg5[%c0_7, %c0_8] : memref<1x256xi32, #tpu.memory_space<vmem>>, vector<1x256xi32>
      %19 = tpu.iota {dimensions = array<i32: 0>} : vector<32x256xi32>
      %20 = vector.broadcast %18 : vector<1x256xi32> to vector<32x256xi32>
      %21 = arith.cmpi eq, %19, %20 : vector<32x256xi32>
      %22 = arith.extui %21 : vector<32x256xi1> to vector<32x256xi32>
      %23 = arith.sitofp %22 : vector<32x256xi32> to vector<32x256xf32>
      %24 = arith.truncf %23 : vector<32x256xf32> to vector<32x256xbf16>
      %c0_9 = arith.constant 0 : index
      %c0_10 = arith.constant 0 : index
      %25 = vector.load %arg9[%c0_9, %c0_10] : memref<32x128xf32, #tpu.memory_space<vmem>>, vector<32x128xf32>
      %26 = arith.truncf %17 : vector<256x128xf32> to vector<256x128xbf16>
      %cst_11 = arith.constant dense<0.000000e+00> : vector<32x128xf32>
      %27 = tpu.matmul %24, %26, %cst_11 {dimension_numbers = #tpu.dot_dimension_numbers<[1], [0], [0], [1], [0, 0, 1, 1], [], []>} : vector<32x256xbf16>, vector<256x128xbf16>, vector<32x128xf32> -> vector<32x128xf32>
      %28 = arith.addf %25, %27 : vector<32x128xf32>
      %c0_12 = arith.constant 0 : index
      %c0_13 = arith.constant 0 : index
      %29 = vector.load %arg9[%c0_12, %c0_13] : memref<32x128xf32, #tpu.memory_space<vmem>>, vector<32x128xf32>
      tpu.vector_store %arg9[%c0_12, %c0_13], %28 {strides = array<i32>} : memref<32x128xf32, #tpu.memory_space<vmem>>, vector<32x128xf32>,
    } else {
    }
    %10 = arith.index_cast %arg0 : i32 to index
    %11 = memref.load %arg3[%10] : memref<4xi32, #tpu.memory_space<smem>>
    %c1_i32_2 = arith.constant 1 : i32
    %12 = arith.cmpi eq, %11, %c1_i32_2 : i32
    %13 = arith.extui %12 : i1 to i32
    %c0_i32_3 = arith.constant 0 : i32
    %14 = arith.cmpi ne, %13, %c0_i32_3 : i32
    scf.if %14 {
      %c0 = arith.constant 0 : index
      %c0_4 = arith.constant 0 : index
      %15 = vector.load %arg9[%c0, %c0_4] : memref<32x128xf32, #tpu.memory_space<vmem>>, vector<32x128xf32>
      %c0_5 = arith.constant 0 : index
      %c0_6 = arith.constant 0 : index
      %16 = vector.load %arg8[%c0_5, %c0_6] : memref<32x128xf32, #tpu.memory_space<vmem>>, vector<32x128xf32>
      tpu.vector_store %arg8[%c0_5, %c0_6], %15 {strides = array<i32>} : memref<32x128xf32, #tpu.memory_space<vmem>>, vector<32x128xf32>,
    } else {
    }
    return
  }
  func.func @transform_0(%arg0: i32, %arg1: memref<4xi32, #tpu.memory_space<smem>>, %arg2: memref<4xi32, #tpu.memory_space<smem>>, %arg3: memref<4xi32, #tpu.memory_space<smem>>, %arg4: memref<4xi32, #tpu.memory_space<smem>>) -> (i32, i32) {
    %c0_i32 = arith.constant 0 : i32
    %c0_i32_0 = arith.constant 0 : i32
    return %c0_i32, %arg0 : i32, i32
  }
  func.func @transform_1(%arg0: i32, %arg1: memref<4xi32, #tpu.memory_space<smem>>, %arg2: memref<4xi32, #tpu.memory_space<smem>>, %arg3: memref<4xi32, #tpu.memory_space<smem>>, %arg4: memref<4xi32, #tpu.memory_space<smem>>) -> (i32, i32) {
    %c0_i32 = arith.constant 0 : i32
    %c0_i32_0 = arith.constant 0 : i32
    return %arg0, %c0_i32 : i32, i32
  }
  func.func @transform_2(%arg0: i32, %arg1: memref<4xi32, #tpu.memory_space<smem>>, %arg2: memref<4xi32, #tpu.memory_space<smem>>, %arg3: memref<4xi32, #tpu.memory_space<smem>>, %arg4: memref<4xi32, #tpu.memory_space<smem>>) -> (i32, i32) {
    %c0_i32 = arith.constant 0 : i32
    %c0_i32_0 = arith.constant 0 : i32
    %c0_i32_1 = arith.constant 0 : i32
    return %c0_i32, %c0_i32_0 : i32, i32
  }
  func.func @transform_3(%arg0: i32, %arg1: memref<4xi32, #tpu.memory_space<smem>>, %arg2: memref<4xi32, #tpu.memory_space<smem>>, %arg3: memref<4xi32, #tpu.memory_space<smem>>, %arg4: memref<4xi32, #tpu.memory_space<smem>>) -> (i32, i32) {
    %0 = arith.index_cast %arg0 : i32 to index
    %1 = memref.load %arg1[%0] : memref<4xi32, #tpu.memory_space<smem>>
    %c0_i32 = arith.constant 0 : i32
    %c0_i32_0 = arith.constant 0 : i32
    return %1, %c0_i32 : i32, i32
  }
}

</mosaic_0001>

<bundles_post_ra>
// kernel: tpu_custom_call.1
= control target key start
LH: loop header
LB: loop body
LE: loop exit
PB: predicated region body
PF: predicated region fallthrough
CT: control target
= control target key end

     0   :  { %s1388_s0 = inlined_call_operand.vmem [shape: s32[4], index: 0, kind: input, shape index: {}]   ;;  %s1389_s4 = inlined_call_operand.vmem [shape: s32[1,1024], index: 4, kind: input, shape index: {}]   ;;  %s1390_s5 = inlined_call_operand.vmem [shape: bf16[1024,48], index: 5, kind: input, shape index: {}]   ;;  %s1391_s6 = inlined_call_operand.vmem [shape: bf16[48,128], index: 6, kind: input, shape index: {}]   ;;  %s1392_s7 = inlined_call_operand.hbm [shape: f32[64,128], index: 7, kind: output, shape index: {}]   ;;  %s1393_s1 = inlined_call_operand.vmem [shape: s32[4], index: 1, kind: input, shape index: {}]   ;;  %s1394_s2 = inlined_call_operand.vmem [shape: s32[4], index: 2, kind: input, shape index: {}]   ;;  %s1395_s3 = inlined_call_operand.vmem [shape: s32[4], index: 3, kind: input, shape index: {}]  }
   0x1   :  { %s12_s26 = sshll.u32 %s1388_s0, 4  ;;  %s16_s29 = sshll.u32 %s1393_s1, 4  ;;  %s13_s26 = int_to_ptr.vmem [resolvable:$true] %s12_s26  ;;  %s17_s29 = int_to_ptr.vmem [resolvable:$true] %s16_s29 }
   0x2   :  { %s1016_s30 = scalar_lea.vmem %s13_s26, 16  ;;  %p1021_p1 = scmp.lt.s32.totalorder %s13_s26, %s13_s26 }
   0x3   :  { %p1017_p0 = scmp.ne.s32.totalorder %s13_s26, %s1016_s30  ;;  %p1022_p2 = scmp.lt.s32.totalorder %s1016_s30, %s1016_s30 }
   0x5   :  { %p1023_p3 = por %p1022_p2, %p1021_p1 }
   0x7   :  { %p1024_p4 = pnand %p1023_p3, %p1017_p0 }
   0x9   :  { %1027 = shalt.err (!%p1024_p4)  }
   0xa   :  { %s1130_s8 = smov [#allocation4]   ;;  %s1028_s9 = scalar_lea.vmem %s17_s29, 16 }
   0xb   :  { %15 = dma.vmem_to_smem %s13_s26, 16, %s1130_s8, [#allocation3] }
   0xc   :  { %p1029_p5 = scmp.ne.s32.totalorder %s17_s29, %s1028_s9  ;;  %p1033_p6 = scmp.lt.s32.totalorder %s17_s29, %s17_s29 }
   0xd   :  { %p1034_p7 = scmp.lt.s32.totalorder %s1028_s9, %s1028_s9 }
   0xf   :  { %p1035_p8 = por %p1034_p7, %p1033_p6 }
  0x11   :  { %p1036_p9 = pnand %p1035_p8, %p1029_p5 }
  0x13   :  { %1039 = shalt.err (!%p1036_p9)  }
  0x14   :  { %s1131_s0 = smov [#allocation5]   ;;  %s20_s11 = sshll.u32 %s1394_s2, 4  ;;  %s21_s11 = int_to_ptr.vmem [resolvable:$true] %s20_s11 }
  0x15   :  { %19 = dma.vmem_to_smem %s17_s29, 16, %s1131_s0, [#allocation3] }
  0x16   :  { %s24_s14 = sshll.u32 %s1395_s3, 4  ;;  %s1040_s15 = scalar_lea.vmem %s21_s11, 16  ;;  %s25_s14 = int_to_ptr.vmem [resolvable:$true] %s24_s14 }
  0x17   :  { %p1041_p10 = scmp.ne.s32.totalorder %s21_s11, %s1040_s15  ;;  %p1045_p11 = scmp.lt.s32.totalorder %s21_s11, %s21_s11 }
  0x18   :  { %p1046_p12 = scmp.lt.s32.totalorder %s1040_s15, %s1040_s15 }
  0x1a   :  { %p1047_p13 = por %p1046_p12, %p1045_p11 }
  0x1c   :  { %p1048_p0 = pnand %p1047_p13, %p1041_p10 }
  0x1e   :  { %1051 = shalt.err (!%p1048_p0)  }
  0x1f   :  { %s1132_s16 = smov [#allocation6]   ;;  %s1052_s17 = scalar_lea.vmem %s25_s14, 16 }
  0x20   :  { %23 = dma.vmem_to_smem %s21_s11, 16, %s1132_s16, [#allocation3] }
  0x21   :  { %p1053_p1 = scmp.ne.s32.totalorder %s25_s14, %s1052_s17  ;;  %p1057_p2 = scmp.lt.s32.totalorder %s25_s14, %s25_s14 }
  0x22   :  { %p1058_p3 = scmp.lt.s32.totalorder %s1052_s17, %s1052_s17 }
  0x24   :  { %p1059_p4 = por %p1058_p3, %p1057_p2 }
  0x26   :  { %p1060_p5 = pnand %p1059_p4, %p1053_p1 }
  0x28   :  { %1063 = shalt.err (!%p1060_p5)  }
  0x29   :  { %s1133_s2 = smov [#allocation7]  }
  0x2a   :  { %27 = dma.vmem_to_smem %s25_s14, 16, %s1133_s2, [#allocation3] }
  0x2b   :  { %1108 = dma.done.wait [#allocation3], 64 }
  0x2c   :  { %1109 = vsyncadd [#allocation3], 4294967232 }
  0x2d   :  { %29 = sfence }
  0x2e   :  { %30 = vsyncpa [#allocation9], 0 }
  0x2f   :  { %32 = vsyncpa [#allocation9 + $0x1], 0  ;;  %s1191_s3 = smov 0   ;;  %s1193_s18 = smov 0  }
  0x30   :  { %s1195_s19 = smov 0   ;;  %s1197_s20 = smov 0  }
  0x31 LB: > { %s1212_s21 = sadd.s32 4294967295, %s1128_s20   ;;  %s795_s22 = sadd.s32 4294967294, %s1128_s20   ;;  %s1128_s20 = sphi %s1197_s20, %s1407_s20   ;;  %s1124_s19 = sphi %s1195_s19, %s1406_s19   ;;  %s1120_s18 = sphi %s1193_s18, %s1405_s18   ;;  %s1116_s3 = sphi %s1191_s3, %s1404_s3  }
  0x32   : > { %s1216_s23 = sadd.s32 1, %s1128_s20   ;;  %s115_s24 = sld [smem:[#allocation4 + %s1128_s20]] }
  0x33   : > { %s116_s25 = sld [smem:[#allocation4 + %s1216_s23]]  ;;  %p130_p6 = scmp.ne.s32.totalorder %s1124_s19, %s1120_s18 }
  0x34   : > { %p131_p7 = scmp.eq.s32.totalorder %s1212_s21, 3  ;;  %p136_p8 = scmp.ne.s32.totalorder %s1120_s18, %s1116_s3 }
  0x35   : > { %p137_p9 = scmp.eq.s32.totalorder %s795_s22, 3  ;;  %p798_p11 = scmp.ge.s32.totalorder %s1128_s20, 1 }
  0x36   : > { %p1225_p10 = por %p131_p7, %p130_p6  ;;  %p175_p13 = scmp.lt.s32.totalorder %s1128_s20, 5 }
  0x37   : > { %p1230_p12 = por %p137_p9, %p136_p8  ;;  %s120_s28 = sadd.s32 1, %s1124_s19 }
  0x38   : > { %p176_p0 = pnand %p798_p11, %p175_p13 }
  0x39   : > { %s117_s29 = ssub.s32 %s115_s24, %s116_s25  ;;  %s200_s8 = sand.u32 (!%p176_p0), 1, %s1120_s18  }
  0x3a   : > { %p118_p1 = scmp.eq.s32.totalorder %s117_s29, 0  ;;  %179 = sbr.rel (%p176_p0) target bundleno = 648 (0x288), region = 32 }
  0x3b   : > { %s800_s9 = sshll.u32 (!%p176_p0), %s1212_s21, 1  ;;  %s799_s0 = sshll.u32 (!%p176_p0), %s200_s8, 5 }
  0x3c   : > { %s1237_s30 = scalar_select %p118_p1, %s1124_s19, %s120_s28  }
  0x3d   : > { %p204_p2 = scmp.lt.s32.totalorder (!%p176_p0), %s800_s9, 7  ;;  %s801_s1 = sshll.u32 (!%p176_p0), %s1212_s21, 5 }
  0x3e   : > { %p209_p3 = scmp.lt.s32.totalorder (!%p176_p0), %s801_s1, 127  ;;  %s217_s10 = sld [smem:[#allocation5 + %s1212_s21]] (!%p176_p0) }
  0x3f   : > { %s1256_s2 = scalar_lea.vmem (!%p176_p0), [#allocation8], %s799_s0 }
  0x41   : > { %s1409_s9 = smov (!%p204_p2, %s800_s9), 7  ;;  %s1411_s1 = smov (!%p209_p3, %s801_s1), 127 }
  0x42   : > { %s206_s13 = scalar_lea.vmem %s1389_s4, %s1409_s9  ;;  %s802_s14 = sshll.u32 %s1411_s1, 2 }
  0x43   : > { %s1254_s17 = scalar_lea.vmem %s1390_s5, %s802_s14 }
  0x44   : > { %p803_p4 = scmp.ne.s32.totalorder %s217_s10, 1 }
  0x45   : > { %v1134_v0 = vmov (!%p803_p4), 0.0  }
  0x46   : > { %221 = sbr.rel (%p803_p4) target bundleno = 77 (0x4d), region = 36  ;;  %222 = vst [vmem:[#allocation2] sm:$0xff] (!%p803_p4), %v1134_v0  ;;  %223 = vst [vmem:[#allocation2 + $0x8] sm:$0xff] (!%p803_p4), %v1134_v0 }
  0x47   : > { %224 = vst [vmem:[#allocation2 + $0x10] sm:$0xff] (!%p803_p4), %v1134_v0  ;;  %225 = vst [vmem:[#allocation2 + $0x18] sm:$0xff] (!%p803_p4), %v1134_v0 }
  0x4d PF: > { %s226_s22 = sld [smem:[#allocation7 + %s1212_s21]] }
  0x53   : > { %p804_p5 = scmp.ne.s32.totalorder %s226_s22, 1 }
  0x54   : > { %v997_v1 = vld [vmem:[%s1391_s6] sm:$0xff] (!%p804_p5)   ;;  %v998_v2 = vld [vmem:[%s1391_s6 + $0x8] sm:$0xff] (!%p804_p5)   ;;  %vm367_vm0 = vcmask (!%p804_p5), 392192   ;;  %v999_v4 = vld [vmem:[%s1391_s6 + $0x10] sm:$0xff] (!%p804_p5)   ;;  %v578_v20 = vlaneseq (!%p804_p5)  ;;  %v1135_v28 = vmov (!%p804_p5), 1.0|1.0  }
  0x55   : > { %230 = sbr.rel (%p804_p5) target bundleno = 606 (0x25e), region = 40  ;;  %910 = vmatprep.subr.bf16.mxu0 (!%p804_p5), %v997_v1  ;;  %v1000_v3 = vld [vmem:[%s1254_s17] sm:$0xff] (!%p804_p5)   ;;  %v1001_v5 = vld [vmem:[%s1254_s17 + $0x8] sm:$0xff] (!%p804_p5)   ;;  %v1002_v6 = vld [vmem:[%s1254_s17 + $0x10] sm:$0xff] (!%p804_p5)  }
  0x56   : > { %911 = vmatpush3.bf16.msra.mxu0 (!%p804_p5), %v997_v1  ;;  %916 = vmatprep.mubr.msk.bf16.mxu0 (!%p804_p5), %vm367_vm0, %v1000_v3  ;;  %v1003_v7 = vld [vmem:[%s1254_s17 + $0x18] sm:$0xff] (!%p804_p5)   ;;  %v1004_v8 = vld [vmem:[%s1254_s17 + $0x20] sm:$0xff] (!%p804_p5)   ;;  %v1005_v9 = vld [vmem:[%s1254_s17 + $0x28] sm:$0xff] (!%p804_p5)   ;;  %v579_v21 = vshrl.u32 (!%p804_p5), %v578_v20, 7 }
  0x57   : > { %912 = vmatprep.subr.bf16.mxu0 (!%p804_p5), %v998_v2  ;;  %v1006_v10 = vld [vmem:[%s1254_s17 + $0x30] sm:$0xff] (!%p804_p5)   ;;  %v1007_v11 = vld [vmem:[%s1254_s17 + $0x38] sm:$0xff] (!%p804_p5)   ;;  %v1008_v12 = vld [vmem:[%s1254_s17 + $0x40] sm:$0xff] (!%p804_p5)  }
  0x58   : > { %v1009_v13 = vld [vmem:[%s1254_s17 + $0x48] sm:$0xff] (!%p804_p5)   ;;  %v1010_v14 = vld [vmem:[%s1254_s17 + $0x50] sm:$0xff] (!%p804_p5)   ;;  %v1011_v15 = vld [vmem:[%s1254_s17 + $0x58] sm:$0xff] (!%p804_p5)   ;;  %v589_v22 = vsub.s32 (!%p804_p5), 1, %v579_v21  ;;  %v585_v24 = vsub.s32 (!%p804_p5), 0, %v579_v21  ;;  %v580_v25 = vadd.s32 (!%p804_p5), 8, %v579_v21 }
  0x59   : > { %v1012_v16 = vld [vmem:[%s1254_s17 + $0x60] sm:$0xff] (!%p804_p5)   ;;  %v1013_v17 = vld [vmem:[%s1254_s17 + $0x68] sm:$0xff] (!%p804_p5)   ;;  %v1014_v18 = vld [vmem:[%s1254_s17 + $0x70] sm:$0xff] (!%p804_p5)   ;;  %v581_v30 = vadd.s32 (!%p804_p5), 16, %v579_v21  ;;  %v582_v31 = vadd.s32 (!%p804_p5), 24, %v579_v21 }
  0x5a   : > { %913 = vmatpush3.bf16.msra.mxu0 (!%p804_p5), %v998_v2  ;;  %v1015_v19 = vld [vmem:[%s1254_s17 + $0x78] sm:$0xff] (!%p804_p5)   ;;  %v577_v23 = vld [vmem:[%s206_s13] sm:$0x3] (!%p804_p5) }
  0x5b   : > { %914 = vmatprep.subr.bf16.mxu0 (!%p804_p5), %v999_v4  ;;  %v590_v26 = vrot.slane (!%p804_p5), %v577_v23, %v589_v22  ;;  %v586_v27 = vrot.slane (!%p804_p5), %v577_v23, %v585_v24  ;;  %v620_v23 = vld [vmem:[#allocation2 + $0x8] sm:$0xff] (!%p804_p5) }
  0x5d   : > { %vm592_vm1 = vcmp.eq.s32.totalorder %v579_v21, %v590_v26  ;;  %vm594_vm2 = vcmp.eq.s32.totalorder %v580_v25, %v590_v26  ;;  %vm591_vm4 = vcmp.eq.s32.totalorder %v579_v21, %v586_v27  ;;  %vm593_vm5 = vcmp.eq.s32.totalorder %v580_v25, %v586_v27 }
  0x5e   : > { %915 = vmatpush3.bf16.msra.mxu0 %v999_v4  ;;  %vm848_vm3 = vmpackc.low %vm594_vm2, %vm592_vm1  ;;  %vm596_vm7 = vcmp.eq.s32.totalorder %v581_v30, %v590_v26  ;;  %vm598_vm8 = vcmp.eq.s32.totalorder %v582_v31, %v590_v26  ;;  %vm595_vm9 = vcmp.eq.s32.totalorder %v581_v30, %v586_v27  ;;  %vm597_vm10 = vcmp.eq.s32.totalorder %v582_v31, %v586_v27  ;;  %v621_v30 = vld [vmem:[#allocation2 + $0x10] sm:$0xff] }
  0x5f   : > { %849 = vmatprep.mubr.msk.bf16.mxu1 %vm848_vm3, %v1135_v28  ;;  %vm1306_vm6 = vmpackc.low %vm593_vm5, %vm591_vm4 }
  0x60   : > { %vm1310_vm11 = vmpackc.low %vm598_vm8, %vm596_vm7 }
  0x61   : > { %917 = vmatmul.mubr.msk.bf16.vlgmr.msra.gmra.mrb[0].mxu0 %vm367_vm0, %v1001_v5  ;;  %vm1314_vm12 = vmpackc.low %vm597_vm10, %vm595_vm9 }
  0x62   : > { %920 = vmatprep.mubr.msk.bf16.mxu0 %vm367_vm0, %v1002_v6 }
  0x69   : > { %921 = vmatmul.mubr.msk.bf16.gmra.mrb[4].mxu0 %vm367_vm0, %v1003_v7 }
  0x6a   : > { %924 = vmatprep.mubr.msk.bf16.mxu0 %vm367_vm0, %v1004_v8 }
  0x71   : > { %925 = vmatmul.mubr.msk.bf16.gmra.mrb[8].mxu0 %vm367_vm0, %v1005_v9 }
  0x72   : > { %928 = vmatprep.mubr.msk.bf16.mxu0 %vm367_vm0, %v1006_v10 }
  0x79   : > { %929 = vmatmul.mubr.msk.bf16.gmra.mrb[12].mxu0 %vm367_vm0, %v1007_v11 }
  0x7a   : > { %932 = vmatprep.mubr.msk.bf16.mxu0 %vm367_vm0, %v1008_v12 }
  0x81   : > { %933 = vmatmul.mubr.msk.bf16.gmra.mrb[16].mxu0 %vm367_vm0, %v1009_v13 }
  0x82   : > { %936 = vmatprep.mubr.msk.bf16.mxu0 %vm367_vm0, %v1010_v14 }
  0x89   : > { %937 = vmatmul.mubr.msk.bf16.gmra.mrb[20].mxu0 %vm367_vm0, %v1011_v15 }
  0x8a   : > { %940 = vmatprep.mubr.msk.bf16.mxu0 %vm367_vm0, %v1012_v16 }
  0x91   : > { %941 = vmatmul.mubr.msk.bf16.gmra.mrb[24].mxu0 %vm367_vm0, %v1013_v17 }
  0x92   : > { %944 = vmatprep.mubr.msk.bf16.mxu0 %vm367_vm0, %v1014_v18 }
  0x99   : > { %945 = vmatmul.mubr.msk.bf16.gmra.mrb[28].mxu0 %vm367_vm0, %v1015_v19  ;;  %v619_v19 = vld [vmem:[#allocation2] sm:$0xff] }
 0x134   : > { %v918_v34 = vpop.f32.mrb[0].mxu0 }
 0x135   : > { %v450_v35 = vpop.f32.mrb[1].mxu0 }
 0x136   : > { %v919_v36 = vpop.f32.mrb[2].mxu0 }
 0x137   : > { %v624_v37 = vpack.c.bf16 %v919_v36, %v918_v34  ;;  %v453_v38 = vpop.f32.mrb[3].mxu0 }
 0x138   : > { %v623_v39 = vpack.c.bf16 %v453_v38, %v450_v35  ;;  %v622_v35 = vld [vmem:[#allocation2 + $0x18] sm:$0xff] }
 0x13c   : > { %v922_v40 = vpop.f32.mrb[4].mxu0 }
 0x13d   : > { %v466_v41 = vpop.f32.mrb[5].mxu0 }
 0x13e   : > { %v923_v42 = vpop.f32.mrb[6].mxu0 }
 0x13f   : > { %v626_v43 = vpack.c.bf16 %v923_v42, %v922_v40  ;;  %v469_v44 = vpop.f32.mrb[7].mxu0 }
 0x140   : > { %v625_v45 = vpack.c.bf16 %v469_v44, %v466_v41 }
 0x144   : > { %v926_v46 = vpop.f32.mrb[8].mxu0 }
 0x145   : > { %v482_v47 = vpop.f32.mrb[9].mxu0 }
 0x146   : > { %v927_v48 = vpop.f32.mrb[10].mxu0 }
 0x147   : > { %v628_v49 = vpack.c.bf16 %v927_v48, %v926_v46  ;;  %v485_v50 = vpop.f32.mrb[11].mxu0 }
 0x148   : > { %v627_v51 = vpack.c.bf16 %v485_v50, %v482_v47 }
 0x14c   : > { %v930_v52 = vpop.f32.mrb[12].mxu0 }
 0x14d   : > { %v498_v53 = vpop.f32.mrb[13].mxu0 }
 0x14e   : > { %v931_v54 = vpop.f32.mrb[14].mxu0 }
 0x14f   : > { %v630_v55 = vpack.c.bf16 %v931_v54, %v930_v52  ;;  %v501_v56 = vpop.f32.mrb[15].mxu0 }
 0x150   : > { %v629_v57 = vpack.c.bf16 %v501_v56, %v498_v53 }
 0x154   : > { %v934_v58 = vpop.f32.mrb[16].mxu0 }
 0x155   : > { %v514_v59 = vpop.f32.mrb[17].mxu0 }
 0x156   : > { %v935_v60 = vpop.f32.mrb[18].mxu0 }
 0x157   : > { %v632_v61 = vpack.c.bf16 %v935_v60, %v934_v58  ;;  %v517_v62 = vpop.f32.mrb[19].mxu0 }
 0x158   : > { %v631_v63 = vpack.c.bf16 %v517_v62, %v514_v59 }
 0x15a   : > { %882 = vmatprep.subr.bf16.mxu1 %v631_v63 }
 0x15b   : > { %883 = vmatpush3.bf16.msra.mxu1 %v623_v39 }
 0x15c   : > { %v938_v0 = vpop.f32.mrb[20].mxu0  ;;  %884 = vmatprep.subr.bf16.mxu1 %v632_v61 }
 0x15d   : > { %v530_v1 = vpop.f32.mrb[21].mxu0 }
 0x15e   : > { %v939_v2 = vpop.f32.mrb[22].mxu0 }
 0x15f   : > { %v634_v3 = vpack.c.bf16 %v939_v2, %v938_v0  ;;  %v533_v4 = vpop.f32.mrb[23].mxu0  ;;  %885 = vmatpush3.bf16.msra.mxu1 %v624_v37 }
 0x160   : > { %v633_v5 = vpack.c.bf16 %v533_v4, %v530_v1 }
 0x162   : > { %886 = vmatprep.subr.bf16.mxu1 %v633_v5 }
 0x163   : > { %887 = vmatpush3.bf16.msra.mxu1 %v625_v45 }
 0x164   : > { %v942_v6 = vpop.f32.mrb[24].mxu0  ;;  %888 = vmatprep.subr.bf16.mxu1 %v634_v3 }
 0x165   : > { %v546_v7 = vpop.f32.mrb[25].mxu0 }
 0x166   : > { %v943_v8 = vpop.f32.mrb[26].mxu0 }
 0x167   : > { %v636_v9 = vpack.c.bf16 %v943_v8, %v942_v6  ;;  %v549_v10 = vpop.f32.mrb[27].mxu0  ;;  %889 = vmatpush3.bf16.msra.mxu1 %v626_v43 }
 0x168   : > { %v635_v11 = vpack.c.bf16 %v549_v10, %v546_v7 }
 0x16a   : > { %890 = vmatprep.subr.bf16.mxu1 %v635_v11 }
 0x16b   : > { %891 = vmatpush3.bf16.msra.mxu1 %v627_v51 }
 0x16c   : > { %v946_v12 = vpop.f32.mrb[28].mxu0  ;;  %892 = vmatprep.subr.bf16.mxu1 %v636_v9 }
 0x16d   : > { %v562_v13 = vpop.f32.mrb[29].mxu0 }
 0x16e   : > { %v947_v14 = vpop.f32.mrb[30].mxu0 }
 0x16f   : > { %v638_v15 = vpack.c.bf16 %v947_v14, %v946_v12  ;;  %v565_v16 = vpop.f32.mrb[31].mxu0  ;;  %893 = vmatpush3.bf16.msra.mxu1 %v628_v49 }
 0x170   : > { %v637_v17 = vpack.c.bf16 %v565_v16, %v562_v13 }
 0x172   : > { %894 = vmatprep.subr.bf16.mxu1 %v637_v17 }
 0x173   : > { %895 = vmatpush3.bf16.msra.mxu1 %v629_v57 }
 0x174   : > { %896 = vmatprep.subr.bf16.mxu1 %v638_v15 }
 0x177   : > { %897 = vmatpush3.bf16.msra.mxu1 %v630_v55 }
 0x17a   : > { %851 = vmatmul.mubr.msk.bf16.vlgmr.msra.gmra.mrb[0].mxu1 %vm1306_vm6, %v1135_v28 }
 0x17b   : > { %853 = vmatprep.mubr.msk.bf16.mxu1 %vm1310_vm11, %v1135_v28 }
 0x182   : > { %855 = vmatmul.mubr.msk.bf16.gmra.mrb[4].mxu1 %vm1314_vm12, %v1135_v28 }
 0x24d   : > { %v898_v18 = vpop.f32.mrb[0].mxu1 }
 0x24e   : > { %v899_v20 = vpop.f32.mrb[1].mxu1 }
 0x24f   : > { %v900_v21 = vadd.f32 %v899_v20, %v898_v18  ;;  %v901_v22 = vpop.f32.mrb[2].mxu1 }
 0x250   : > { %v902_v24 = vpop.f32.mrb[3].mxu1 }
 0x251   : > { %v688_v25 = vadd.f32 %v900_v21, %v619_v19  ;;  %v903_v26 = vadd.f32 %v902_v24, %v901_v22 }
 0x253   : > { %692 = vst [vmem:[#allocation2] sm:$0xff] %v688_v25  ;;  %v689_v27 = vadd.f32 %v903_v26, %v620_v23 }
 0x255   : > { %693 = vst [vmem:[#allocation2 + $0x8] sm:$0xff] %v689_v27  ;;  %v904_v29 = vpop.f32.mrb[4].mxu1 }
 0x256   : > { %v905_v31 = vpop.f32.mrb[5].mxu1 }
 0x257   : > { %v906_v32 = vadd.f32 %v905_v31, %v904_v29  ;;  %v907_v34 = vpop.f32.mrb[6].mxu1 }
 0x258   : > { %v908_v33 = vpop.f32.mrb[7].mxu1 }
 0x259   : > { %v690_v28 = vadd.f32 %v906_v32, %v621_v30  ;;  %v909_v36 = vadd.f32 %v908_v33, %v907_v34 }
 0x25b   : > { %694 = vst [vmem:[#allocation2 + $0x10] sm:$0xff] %v690_v28  ;;  %v691_v37 = vadd.f32 %v909_v36, %v622_v35 }
 0x25d   : > { %695 = vst [vmem:[#allocation2 + $0x18] sm:$0xff] %v691_v37 }
 0x25e PF: > { %s696_s9 = sld [smem:[#allocation6 + %s1212_s21]] }
 0x264   : > { %p856_p6 = scmp.ne.s32.totalorder %s696_s9, 1 }
 0x265   : > { %v701_v38 = vld [vmem:[#allocation2] sm:$0xff] (!%p856_p6)  ;;  %v702_v39 = vld [vmem:[#allocation2 + $0x8] sm:$0xff] (!%p856_p6)  ;;  %v703_v40 = vld [vmem:[#allocation2 + $0x10] sm:$0xff] (!%p856_p6) }
 0x266   : > { %700 = sbr.rel (%p856_p6) target bundleno = 621 (0x26d), region = 44  ;;  %705 = vst [vmem:[%s1256_s2] sm:$0xff] (!%p856_p6), %v701_v38  ;;  %706 = vst [vmem:[%s1256_s2 + $0x8] sm:$0xff] (!%p856_p6), %v702_v39  ;;  %v704_v41 = vld [vmem:[#allocation2 + $0x18] sm:$0xff] (!%p856_p6) }
 0x267   : > { %707 = vst [vmem:[%s1256_s2 + $0x10] sm:$0xff] (!%p856_p6), %v703_v40  ;;  %708 = vst [vmem:[%s1256_s2 + $0x18] sm:$0xff] (!%p856_p6), %v704_v41 }
 0x26d PF: > { %s948_s12 = scalar_select %p1225_p10, [#allocation4], [#allocation10] }
 0x26e   : > { %s1413_s21 = smov (!%p1225_p10, %s1212_s21), 0  ;;  %s724_s14 = sshll.u32 %s1256_s2, 4  ;;  %s1338_s14 = int_to_ptr.vmem [resolvable:$true] %s724_s14 }
 0x26f   : > { %s717_s13 = sld [smem:[%s948_s12 + %s1413_s21]]  ;;  %s1347_s24 = scalar_lea.sflag [#allocation9], %s200_s8 }
 0x270   : > { %s1064_s25 = scalar_lea.vmem %s1338_s14, 512  ;;  %s1136_s21 = smov [#allocation8]  }
 0x271   : > { %p1065_p7 = scmp.ne.s32.totalorder %s1338_s14, %s1064_s25  ;;  %s1068_s2 = sshll.u32 %s1136_s21, 4  ;;  %s1069_s2 = int_to_ptr.vmem [resolvable:$false] %s1068_s2 }
 0x272   : > { %s1070_s28 = scalar_lea.vmem %s1069_s2, 1024  ;;  %p1071_p11 = scmp.lt.s32.totalorder %s1338_s14, %s1069_s2 }
 0x273   : > { %p1066_p8 = pnand %p1065_p7, %p1225_p10  ;;  %p1072_p13 = scmp.lt.s32.totalorder %s1070_s28, %s1064_s25 }
 0x275   : > { %s862_s15 = sshll.u32 %s717_s13, 9  ;;  %p1067_p9 = pneg %p1066_p8 }
 0x276   : > { %s1343_s22 = scalar_lea.hbm %s1392_s7, %s862_s15  ;;  %p1073_p0 = por %p1072_p13, %p1071_p11 }
 0x278   : > { %p1074_p1 = pnand %p1073_p0, %p1067_p9 }
 0x27a   : > { %1077 = shalt.err (!%p1074_p1)
}
 0x27b   : > { %s1078_s8 = scalar_lea.hbm %s1343_s22, 512  ;;  %s1082_s1 = scalar_lea.hbm %s1392_s7, 1024 }
 0x27c   : > { %p1079_p2 = scmp.ne.s32.totalorder %s1343_s22, %s1078_s8  ;;  %p1083_p5 = scmp.lt.u32.totalorder %s1343_s22, %s1392_s7 }
 0x27d   : > { %p1084_p6 = scmp.lt.u32.totalorder %s1082_s1, %s1078_s8  ;;  %p1086_p8 = scmp.lt.u32.totalorder %s1078_s8, %s1343_s22 }
 0x27e   : > { %p1080_p3 = pnand %p1079_p2, %p1225_p10 }
 0x27f   : > { %p1085_p7 = por %p1084_p6, %p1083_p5 }
 0x280   : > { %p1081_p4 = pneg %p1080_p3 }
 0x281   : > { %p1087_p9 = por %p1086_p8, %p1085_p7 }
 0x283   : > { %p1088_p11 = pnand %p1087_p9, %p1081_p4 }
 0x285   : > { %1091 = shalt.err (!%p1088_p11)
}
 0x286   : > { %s1137_s9 = smov 128   ;;  %s1138_s12 = smov 8  }
 0x287   : > { %950 = dma.vmem_to_hbm [thread:$0]  (%p1225_p10), %s1338_s14, 512, %s1343_s22, %s1347_s24, %s1137_s9, %s1137_s9, %s1138_s12  }
 0x288 PF: > { %p956_p13 = scmp.ge.s32.totalorder %s1128_s20, 2  ;;  %s739_s13 = sand.u32 1, %s1116_s3  }
 0x289   : > { %s740_s15 = scalar_lea.sflag [#allocation9], %s739_s13 }
 0x28a   : > { %p953_p0 = pnand %p956_p13, %p1230_p12 }
 0x28c   : > { %1111 = dma.done.wait (!%p953_p0), %s740_s15, 512  }
 0x28d   : > { %1113 = vsyncadd (!%p953_p0), %s740_s15, 4294966784  ;;  %p35_p1 = scmp.ge.s32.totalorder %s1216_s23, 6   ;;  %s1404_s3 = smov %s1120_s18 }
 0x28e   : > { %s1405_s18 = smov %s1124_s19  ;;  %s1406_s19 = smov %s1237_s30 }
 0x28f   : > { %s1407_s20 = smov %s1216_s23  ;;  %37 = sbr.rel (!%p35_p1) target bundleno = 49 (0x31), region = 82 }
 0x296   :  { %745 = vsyncpa [#allocation9], 1 }
 0x297   :  { %747 = vsyncpa [#allocation9 + $0x1], 1 }

</bundles_post_ra>
